<compile_context>
chip_gen: v6e
topology: v6e:2x2x1
jax: 0.10.0
libtpu: 0.0.40
codegen_flags: <defaults>
</compile_context>

<pallas_src>
import functools

import jax
import jax.numpy as jnp
import numpy as np
from jax.experimental import pallas as pl
from jax.experimental.pallas import tpu as pltpu


# ------------------------------ Pallas kernel ------------------------------

def _rgcn_fused_kernel(*refs, edge_dim, n_mid_layers):
    # ref layout (inputs..., output):
    #   x_ref:     (B*N, nfeat)          node features, batch folded into sublanes
    #   abd_ref:   (E*B*N, E*B*N)        adjacency, block-diagonal over (edge, batch)
    #   awide_ref: (B*N, E*B*N)          hstack of per-edge batch block-diagonals
    #   w1_ref:    (E, nfeat, nhid)      gc1 weights with emb folded in
    #   w2_ref:    (L2, E, nhid, nhid)   gc2 stack (only present if L2 > 0)
    #   w3_ref:    (E, nhid, nout)       gc3 weights
    #   o_ref:     (B*N, nout)
    if n_mid_layers > 0:
        x_ref, abd_ref, awide_ref, w1_ref, w2_ref, w3_ref, o_ref = refs
    else:
        x_ref, abd_ref, awide_ref, w1_ref, w3_ref, o_ref = refs
        w2_ref = None

    bn = x_ref.shape[0]                      # B*N
    E = edge_dim

    h = x_ref[...].astype(jnp.float32)       # (BN, nfeat)
    a_bd = abd_ref[...]                      # (E*BN, E*BN)
    a_wide = awide_ref[...]                  # (BN, E*BN)

    def support_stack(h, w):
        # w: (E, Din, Dout).  S_stack[e*BN + r, :] = h[r, :] @ w[e]
        # E independent MXU matmuls; the sublane concat is pure vreg placement.
        parts = [jnp.dot(h, w[e], preferred_element_type=jnp.float32)
                 for e in range(E)]
        return jnp.concatenate(parts, axis=0)            # (E*BN, Dout)

    def relu_layer(h, w):
        s = support_stack(h, w)                          # (E*BN, Dout)
        out = jnp.dot(a_bd, s, preferred_element_type=jnp.float32)
        out = jnp.maximum(out, 0.0)                      # ReLU per edge, THEN sum
        acc = out[0:bn]                                  # init from edge 0 (no zero-fill)
        for e in range(1, E):
            acc = acc + out[e * bn:(e + 1) * bn]         # aggregate='sum' over edges
        return acc                                       # (BN, Dout)

    h = relu_layer(h, w1_ref[...])                       # gc1 (emb already folded in)
    if n_mid_layers > 0:
        w2_all = w2_ref[...]                             # (L2, E, nhid, nhid)
        for l in range(n_mid_layers):                    # static unroll (tiny count)
            h = relu_layer(h, w2_all[l])

    # gc3: no ReLU, so the edge-sum commutes with the matmul; A_wide does both
    # in one matmul whose result is the output slab directly.
    s = support_stack(h, w3_ref[...])                    # (E*BN, nout)
    o_ref[...] = jnp.dot(a_wide, s,
                         preferred_element_type=jnp.float32).astype(o_ref.dtype)


# ------------------------------ host wrappers -------------------------------

def _pack_block_adj(adj):
    """adj (B, E, N, N) ->
         A_bd   (E*B*N, E*B*N): block-diagonal over (edge, batch)
         A_wide (B*N, E*B*N)  : [blkdiag_b(adj[:,0]) | blkdiag_b(adj[:,1]) | ...]
    """
    B, E, N, _ = adj.shape
    eye_b = jnp.eye(B, dtype=adj.dtype)
    # per-edge batch block-diagonal: a_e[e, b*N+i, c*N+j] = adj[b,e,i,j] * (b==c)
    a_e = jnp.einsum("beij,bc->ebicj", adj, eye_b).reshape(E, B * N, B * N)
    a_wide = jnp.transpose(a_e, (1, 0, 2)).reshape(B * N, E * B * N)
    eye_e = jnp.eye(E, dtype=adj.dtype)
    a_bd = jnp.einsum("eij,ef->eifj", a_e, eye_e).reshape(E * B * N, E * B * N)
    return a_bd, a_wide


def rgcn_forward(params, x, adj):
    """Fused RGCN forward: a single grid-less pallas_call, everything in VMEM."""
    B, N, nfeat = x.shape
    E = adj.shape[1]
    nout = params["gc3_w"].shape[2]
    n_mid = len(params["gc2_ws"])
    BN = B * N

    # Fold emb (Linear(nfeat, nfeat, bias=False), dropout p=0) into gc1:
    #   W1_eff[e] = W_emb^T @ W_gc1[e]
    w1 = jnp.einsum("dk,ekh->edh", params["emb_w_t"], params["gc1_w"])
    w3 = params["gc3_w"]
    a_bd, a_wide = _pack_block_adj(adj)
    x_flat = x.reshape(BN, nfeat)

    args = [x_flat, a_bd, a_wide, w1]
    if n_mid > 0:
        args.append(jnp.stack(params["gc2_ws"], axis=0))   # (L2, E, nhid, nhid)
    args.append(w3)

    kernel = functools.partial(_rgcn_fused_kernel,
                               edge_dim=E, n_mid_layers=n_mid)

    out_flat = pl.pallas_call(
        kernel,
        out_shape=jax.ShapeDtypeStruct((BN, nout), x.dtype),
        in_specs=[pl.BlockSpec(memory_space=pltpu.MemorySpace.VMEM)] * len(args),
        out_specs=pl.BlockSpec(memory_space=pltpu.MemorySpace.VMEM),
    )(*args)
    return out_flat.reshape(B, N, nout)


def rgcn_reference(params, x, adj):
    """Pure-JAX reference mirroring the PyTorch einsum semantics (unfused)."""
    h = x @ params["emb_w_t"]

    def rgc(h, w, relu):
        support = jnp.einsum("bid,edh->beih", h, w)
        out = jnp.einsum("beij,bejh->beih", adj, support)
        if relu:
            out = jnp.maximum(out, 0.0)
        return jnp.sum(out, axis=1)

    h = rgc(h, params["gc1_w"], True)
    for w in params["gc2_ws"]:
        h = rgc(h, w, True)
    h = rgc(h, params["gc3_w"], False)
    return h


# ------------------------------ parameter init ------------------------------

def _xavier_uniform(key, shape):
    # torch xavier_uniform_ on a (E, in, out) tensor:
    # fan_in = size(1) * prod(dims[2:]), fan_out = size(0) * prod(dims[2:])
    if len(shape) == 3:
        rf = shape[2]
        fan_in, fan_out = shape[1] * rf, shape[0] * rf
    else:
        fan_in, fan_out = shape[1], shape[0]
    bound = float(np.sqrt(6.0 / (fan_in + fan_out)))
    return jax.random.uniform(key, shape, jnp.float32, -bound, bound)


def init_rgcn_params(key, nfeat, nhid, nout, edge_dim, num_layers):
    keys = jax.random.split(key, 3 + (num_layers - 2))
    params = {
        # stored directly as W.T of the torch nn.Linear(nfeat, nfeat)
        "emb_w_t": _xavier_uniform(keys[0], (nfeat, nfeat)),
        "gc1_w": _xavier_uniform(keys[1], (edge_dim, nfeat, nhid)),
        "gc2_ws": [
            _xavier_uniform(keys[2 + i], (edge_dim, nhid, nhid))
            for i in range(num_layers - 2)
        ],
        "gc3_w": _xavier_uniform(keys[2 + (num_layers - 2)],
                                 (edge_dim, nhid, nout)),
    }
    return params


# ---------------------------------- main ------------------------------------

if __name__ == "__main__":
    B, N, nfeat = 2, 8, 9          # typical GraphDF molecule sizes (d = 9)
    edge_dim = 3
    nhid, nout, num_layers = 32, 32, 3

    key = jax.random.PRNGKey(0)
    k_x, k_adj, k_p = jax.random.split(key, 3)

    x = jax.random.normal(k_x, (B, N, nfeat), jnp.float32)
    adj = jax.random.uniform(k_adj, (B, edge_dim, N, N), jnp.float32)

    params = init_rgcn_params(k_p, nfeat, nhid, nout, edge_dim, num_layers)

    fwd = jax.jit(rgcn_forward)
    out = jax.block_until_ready(fwd(params, x, adj))

    ref = rgcn_reference(params, x, adj)
    np.testing.assert_allclose(np.asarray(out), np.asarray(ref),
                               rtol=1e-4, atol=1e-3)

    print("KERNEL_OK")
</pallas_src>

<mosaic_0001>
module attributes {stable_mosaic.version = 11 : i64} {
  func.func @_rgcn_fused_kernel(%arg0: memref<16x9xf32, #tpu.memory_space<vmem>>, %arg1: memref<48x48xf32, #tpu.memory_space<vmem>>, %arg2: memref<16x48xf32, #tpu.memory_space<vmem>>, %arg3: memref<3x9x32xf32, #tpu.memory_space<vmem>>, %arg4: memref<1x3x32x32xf32, #tpu.memory_space<vmem>>, %arg5: memref<3x32x32xf32, #tpu.memory_space<vmem>>, %arg6: memref<16x32xf32, #tpu.memory_space<vmem>>) attributes {dimension_semantics = [], scalar_prefetch = 0 : i64, scratch_operands = 0 : i64, tpu.core_type = #tpu.core_type<tc>} {
    %c0 = arith.constant 0 : index
    %c0_0 = arith.constant 0 : index
    %0 = vector.load %arg0[%c0, %c0_0] : memref<16x9xf32, #tpu.memory_space<vmem>>, vector<16x9xf32>
    %c0_1 = arith.constant 0 : index
    %c0_2 = arith.constant 0 : index
    %1 = vector.load %arg1[%c0_1, %c0_2] : memref<48x48xf32, #tpu.memory_space<vmem>>, vector<48x48xf32>
    %c0_3 = arith.constant 0 : index
    %c0_4 = arith.constant 0 : index
    %2 = vector.load %arg2[%c0_3, %c0_4] : memref<16x48xf32, #tpu.memory_space<vmem>>, vector<16x48xf32>
    %c0_5 = arith.constant 0 : index
    %c0_6 = arith.constant 0 : index
    %c0_7 = arith.constant 0 : index
    %3 = vector.load %arg3[%c0_5, %c0_6, %c0_7] : memref<3x9x32xf32, #tpu.memory_space<vmem>>, vector<3x9x32xf32>
    %4 = vector.extract_strided_slice %3 {offsets = [0, 0, 0], sizes = [1, 9, 32], strides = [1, 1, 1]} : vector<3x9x32xf32> to vector<1x9x32xf32>
    %5 = vector.shape_cast %4 : vector<1x9x32xf32> to vector<9x32xf32>
    %cst = arith.constant dense<0.000000e+00> : vector<16x32xf32>
    %6 = tpu.matmul %0, %5, %cst {dimension_numbers = #tpu.dot_dimension_numbers<[1], [0], [0], [1], [0, 0, 1, 1], [], []>} : vector<16x9xf32>, vector<9x32xf32>, vector<16x32xf32> -> vector<16x32xf32>
    %7 = vector.extract_strided_slice %3 {offsets = [1, 0, 0], sizes = [1, 9, 32], strides = [1, 1, 1]} : vector<3x9x32xf32> to vector<1x9x32xf32>
    %8 = vector.shape_cast %7 : vector<1x9x32xf32> to vector<9x32xf32>
    %cst_8 = arith.constant dense<0.000000e+00> : vector<16x32xf32>
    %9 = tpu.matmul %0, %8, %cst_8 {dimension_numbers = #tpu.dot_dimension_numbers<[1], [0], [0], [1], [0, 0, 1, 1], [], []>} : vector<16x9xf32>, vector<9x32xf32>, vector<16x32xf32> -> vector<16x32xf32>
    %10 = vector.extract_strided_slice %3 {offsets = [2, 0, 0], sizes = [1, 9, 32], strides = [1, 1, 1]} : vector<3x9x32xf32> to vector<1x9x32xf32>
    %11 = vector.shape_cast %10 : vector<1x9x32xf32> to vector<9x32xf32>
    %cst_9 = arith.constant dense<0.000000e+00> : vector<16x32xf32>
    %12 = tpu.matmul %0, %11, %cst_9 {dimension_numbers = #tpu.dot_dimension_numbers<[1], [0], [0], [1], [0, 0, 1, 1], [], []>} : vector<16x9xf32>, vector<9x32xf32>, vector<16x32xf32> -> vector<16x32xf32>
    %13 = tpu.concatenate %6, %9, %12 in 0 : vector<16x32xf32>, vector<16x32xf32>, vector<16x32xf32> -> vector<48x32xf32>
    %cst_10 = arith.constant dense<0.000000e+00> : vector<48x32xf32>
    %14 = tpu.matmul %1, %13, %cst_10 {dimension_numbers = #tpu.dot_dimension_numbers<[1], [0], [0], [1], [0, 0, 1, 1], [], []>} : vector<48x48xf32>, vector<48x32xf32>, vector<48x32xf32> -> vector<48x32xf32>
    %cst_11 = arith.constant 0.000000e+00 : f32
    %15 = vector.broadcast %cst_11 : f32 to vector<48x32xf32>
    %16 = arith.maximumf %14, %15 : vector<48x32xf32>
    %17 = vector.extract_strided_slice %16 {offsets = [0, 0], sizes = [16, 32], strides = [1, 1]} : vector<48x32xf32> to vector<16x32xf32>
    %18 = vector.extract_strided_slice %16 {offsets = [16, 0], sizes = [16, 32], strides = [1, 1]} : vector<48x32xf32> to vector<16x32xf32>
    %19 = arith.addf %17, %18 : vector<16x32xf32>
    %20 = vector.extract_strided_slice %16 {offsets = [32, 0], sizes = [16, 32], strides = [1, 1]} : vector<48x32xf32> to vector<16x32xf32>
    %21 = arith.addf %19, %20 : vector<16x32xf32>
    %c0_12 = arith.constant 0 : index
    %c0_13 = arith.constant 0 : index
    %c0_14 = arith.constant 0 : index
    %c0_15 = arith.constant 0 : index
    %22 = vector.load %arg4[%c0_12, %c0_13, %c0_14, %c0_15] : memref<1x3x32x32xf32, #tpu.memory_space<vmem>>, vector<1x3x32x32xf32>
    %23 = vector.shape_cast %22 : vector<1x3x32x32xf32> to vector<3x32x32xf32>
    %24 = vector.extract_strided_slice %23 {offsets = [0, 0, 0], sizes = [1, 32, 32], strides = [1, 1, 1]} : vector<3x32x32xf32> to vector<1x32x32xf32>
    %25 = vector.shape_cast %24 : vector<1x32x32xf32> to vector<32x32xf32>
    %cst_16 = arith.constant dense<0.000000e+00> : vector<16x32xf32>
    %26 = tpu.matmul %21, %25, %cst_16 {dimension_numbers = #tpu.dot_dimension_numbers<[1], [0], [0], [1], [0, 0, 1, 1], [], []>} : vector<16x32xf32>, vector<32x32xf32>, vector<16x32xf32> -> vector<16x32xf32>
    %27 = vector.extract_strided_slice %23 {offsets = [1, 0, 0], sizes = [1, 32, 32], strides = [1, 1, 1]} : vector<3x32x32xf32> to vector<1x32x32xf32>
    %28 = vector.shape_cast %27 : vector<1x32x32xf32> to vector<32x32xf32>
    %cst_17 = arith.constant dense<0.000000e+00> : vector<16x32xf32>
    %29 = tpu.matmul %21, %28, %cst_17 {dimension_numbers = #tpu.dot_dimension_numbers<[1], [0], [0], [1], [0, 0, 1, 1], [], []>} : vector<16x32xf32>, vector<32x32xf32>, vector<16x32xf32> -> vector<16x32xf32>
    %30 = vector.extract_strided_slice %23 {offsets = [2, 0, 0], sizes = [1, 32, 32], strides = [1, 1, 1]} : vector<3x32x32xf32> to vector<1x32x32xf32>
    %31 = vector.shape_cast %30 : vector<1x32x32xf32> to vector<32x32xf32>
    %cst_18 = arith.constant dense<0.000000e+00> : vector<16x32xf32>
    %32 = tpu.matmul %21, %31, %cst_18 {dimension_numbers = #tpu.dot_dimension_numbers<[1], [0], [0], [1], [0, 0, 1, 1], [], []>} : vector<16x32xf32>, vector<32x32xf32>, vector<16x32xf32> -> vector<16x32xf32>
    %33 = tpu.concatenate %26, %29, %32 in 0 : vector<16x32xf32>, vector<16x32xf32>, vector<16x32xf32> -> vector<48x32xf32>
    %cst_19 = arith.constant dense<0.000000e+00> : vector<48x32xf32>
    %34 = tpu.matmul %1, %33, %cst_19 {dimension_numbers = #tpu.dot_dimension_numbers<[1], [0], [0], [1], [0, 0, 1, 1], [], []>} : vector<48x48xf32>, vector<48x32xf32>, vector<48x32xf32> -> vector<48x32xf32>
    %cst_20 = arith.constant 0.000000e+00 : f32
    %35 = vector.broadcast %cst_20 : f32 to vector<48x32xf32>
    %36 = arith.maximumf %34, %35 : vector<48x32xf32>
    %37 = vector.extract_strided_slice %36 {offsets = [0, 0], sizes = [16, 32], strides = [1, 1]} : vector<48x32xf32> to vector<16x32xf32>
    %38 = vector.extract_strided_slice %36 {offsets = [16, 0], sizes = [16, 32], strides = [1, 1]} : vector<48x32xf32> to vector<16x32xf32>
    %39 = arith.addf %37, %38 : vector<16x32xf32>
    %40 = vector.extract_strided_slice %36 {offsets = [32, 0], sizes = [16, 32], strides = [1, 1]} : vector<48x32xf32> to vector<16x32xf32>
    %41 = arith.addf %39, %40 : vector<16x32xf32>
    %c0_21 = arith.constant 0 : index
    %c0_22 = arith.constant 0 : index
    %c0_23 = arith.constant 0 : index
    %42 = vector.load %arg5[%c0_21, %c0_22, %c0_23] : memref<3x32x32xf32, #tpu.memory_space<vmem>>, vector<3x32x32xf32>
    %43 = vector.extract_strided_slice %42 {offsets = [0, 0, 0], sizes = [1, 32, 32], strides = [1, 1, 1]} : vector<3x32x32xf32> to vector<1x32x32xf32>
    %44 = vector.shape_cast %43 : vector<1x32x32xf32> to vector<32x32xf32>
    %cst_24 = arith.constant dense<0.000000e+00> : vector<16x32xf32>
    %45 = tpu.matmul %41, %44, %cst_24 {dimension_numbers = #tpu.dot_dimension_numbers<[1], [0], [0], [1], [0, 0, 1, 1], [], []>} : vector<16x32xf32>, vector<32x32xf32>, vector<16x32xf32> -> vector<16x32xf32>
    %46 = vector.extract_strided_slice %42 {offsets = [1, 0, 0], sizes = [1, 32, 32], strides = [1, 1, 1]} : vector<3x32x32xf32> to vector<1x32x32xf32>
    %47 = vector.shape_cast %46 : vector<1x32x32xf32> to vector<32x32xf32>
    %cst_25 = arith.constant dense<0.000000e+00> : vector<16x32xf32>
    %48 = tpu.matmul %41, %47, %cst_25 {dimension_numbers = #tpu.dot_dimension_numbers<[1], [0], [0], [1], [0, 0, 1, 1], [], []>} : vector<16x32xf32>, vector<32x32xf32>, vector<16x32xf32> -> vector<16x32xf32>
    %49 = vector.extract_strided_slice %42 {offsets = [2, 0, 0], sizes = [1, 32, 32], strides = [1, 1, 1]} : vector<3x32x32xf32> to vector<1x32x32xf32>
    %50 = vector.shape_cast %49 : vector<1x32x32xf32> to vector<32x32xf32>
    %cst_26 = arith.constant dense<0.000000e+00> : vector<16x32xf32>
    %51 = tpu.matmul %41, %50, %cst_26 {dimension_numbers = #tpu.dot_dimension_numbers<[1], [0], [0], [1], [0, 0, 1, 1], [], []>} : vector<16x32xf32>, vector<32x32xf32>, vector<16x32xf32> -> vector<16x32xf32>
    %52 = tpu.concatenate %45, %48, %51 in 0 : vector<16x32xf32>, vector<16x32xf32>, vector<16x32xf32> -> vector<48x32xf32>
    %cst_27 = arith.constant dense<0.000000e+00> : vector<16x32xf32>
    %53 = tpu.matmul %2, %52, %cst_27 {dimension_numbers = #tpu.dot_dimension_numbers<[1], [0], [0], [1], [0, 0, 1, 1], [], []>} : vector<16x48xf32>, vector<48x32xf32>, vector<16x32xf32> -> vector<16x32xf32>
    %c0_28 = arith.constant 0 : index
    %c0_29 = arith.constant 0 : index
    %54 = vector.load %arg6[%c0_28, %c0_29] : memref<16x32xf32, #tpu.memory_space<vmem>>, vector<16x32xf32>
    tpu.vector_store %arg6[%c0_28, %c0_29], %53 {strides = array<i32>} : memref<16x32xf32, #tpu.memory_space<vmem>>, vector<16x32xf32>,
    return
  }
}

</mosaic_0001>

<bundles_post_ra>
// kernel: rgcn_forward.1
= control target key start
LH: loop header
LB: loop body
LE: loop exit
PB: predicated region body
PF: predicated region fallthrough
CT: control target
= control target key end

     0   :  { %vm47_vm0 = vcmask 1040384   ;;  %vm40_vm1 = vcmask 72704   ;;  %s1606_s0 = inlined_call_operand.vmem [shape: f32[16,9], index: 0, kind: input, shape index: {}]   ;;  %s1607_s1 = inlined_call_operand.vmem [shape: f32[48,48], index: 1, kind: input, shape index: {}]   ;;  %s1608_s2 = inlined_call_operand.vmem [shape: f32[16,48], index: 2, kind: input, shape index: {}]   ;;  %s1609_s3 = inlined_call_operand.vmem [shape: f32[3,9,32], index: 3, kind: input, shape index: {}]   ;;  %s1610_s4 = inlined_call_operand.vmem [shape: f32[1,3,32,32], index: 4, kind: input, shape index: {}]   ;;  %s1611_s5 = inlined_call_operand.vmem [shape: f32[3,32,32], index: 5, kind: input, shape index: {}]   ;;  %s1612_s6 = inlined_call_operand.hbm [shape: f32[16,32], index: 6, kind: output, shape index: {}]  }
   0x1   :  { %v35_v0 = vld [vmem:[%s1609_s3 + $0x8] sm:$0x1]  ;;  %v34_v1 = vld [vmem:[%s1609_s3] sm:$0xff]  ;;  %v37_v4 = vld [vmem:[%s1609_s3 + $0x18] sm:$0x1] }
   0x2   :  { %v24_v2 = vld [vmem:[%s1606_s0] sm:$0xff]  ;;  %1212 = vmatprep.subr.msk.mxu0 %vm47_vm0, %v35_v0  ;;  %v25_v3 = vld [vmem:[%s1606_s0 + $0x8] sm:$0xff] }
   0x3   :  { %1216 = vmatprep.mubr.msk.f32.mxu0 %vm40_vm1, %v24_v2  ;;  %1213 = vmatpush3.msk.msra.mxu0 %vm47_vm0, %v35_v0 }
   0x4   :  { %11 = vsyncpa [#allocation3], 0  ;;  %1214 = vmatprep.subr.mxu0 %v34_v1  ;;  %v36_v5 = vld [vmem:[%s1609_s3 + $0x10] sm:$0xff]  ;;  %v39_v6 = vld [vmem:[%s1609_s3 + $0x28] sm:$0x1]  ;;  %vm282_vm2 = vcmask 392192  }
   0x5   :  { %1215 = vmatpush3.msra.mxu0 %v34_v1  ;;  %v38_v7 = vld [vmem:[%s1609_s3 + $0x20] sm:$0xff]  ;;  %v1465_v15 = vld [vmem:[%s1607_s1 + $0x8] sm:$0xff]  ;;  %v1470_v16 = vld [vmem:[%s1607_s1 + $0x10] sm:$0xff]  ;;  %vm418_vm3 = vcmask 261120   ;;  %s1381_s19 = smov [#allocation2]  }
   0x6   :  { %1217 = vmatmul.mubr.msk.f32.vlgmr.msra.gmra.mxu0 %vm40_vm1, %v25_v3  ;;  %1219 = vmatprep.subr.msk.mxu0 %vm47_vm0, %v37_v4  ;;  %v1458_v8 = vld [vmem:[%s1607_s1] sm:$0xff]  ;;  %v1479_v17 = vld [vmem:[%s1607_s1 + $0x18] sm:$0xff]  ;;  %v1493_v19 = vld [vmem:[%s1607_s1 + $0x28] sm:$0xff] }
   0x7   :  { %1220 = vmatpush3.msk.msra.mxu0 %vm47_vm0, %v37_v4  ;;  %1223 = vmatprep.mubr.msk.f32.mxu0 %vm40_vm1, %v24_v2  ;;  %v1484_v18 = vld [vmem:[%s1607_s1 + $0x20] sm:$0xff]  ;;  %v409_v20 = vld [vmem:[%s1610_s4 + $0x18] sm:$0xff]  ;;  %v408_v22 = vld [vmem:[%s1610_s4 + $0x10] sm:$0xff] }
   0x8   :  { %1221 = vmatprep.subr.mxu0 %v36_v5  ;;  %1245 = vmatprep.mubr.msk.f32.mxu1 %vm282_vm2, %v1458_v8  ;;  %v417_v21 = vld [vmem:[%s1610_s4 + $0x58] sm:$0xff]  ;;  %v416_v23 = vld [vmem:[%s1610_s4 + $0x50] sm:$0xff]  ;;  %v407_v24 = vld [vmem:[%s1610_s4 + $0x8] sm:$0xff] }
   0x9   :  { %1222 = vmatpush3.msra.mxu0 %v36_v5  ;;  %v415_v25 = vld [vmem:[%s1610_s4 + $0x48] sm:$0xff]  ;;  %v406_v26 = vld [vmem:[%s1610_s4] sm:$0xff]  ;;  %v413_v28 = vld [vmem:[%s1610_s4 + $0x38] sm:$0xff] }
   0xa   :  { %1224 = vmatmul.mubr.msk.f32.vlgmr.msra.gmra.mxu0 %vm40_vm1, %v25_v3  ;;  %1226 = vmatprep.subr.msk.mxu0 %vm47_vm0, %v39_v6  ;;  %v414_v27 = vld [vmem:[%s1610_s4 + $0x40] sm:$0xff]  ;;  %v412_v45 = vld [vmem:[%s1610_s4 + $0x30] sm:$0xff]  ;;  %v411_v46 = vld [vmem:[%s1610_s4 + $0x28] sm:$0xff] }
   0xb   :  { %1227 = vmatpush3.msk.msra.mxu0 %vm47_vm0, %v39_v6  ;;  %1230 = vmatprep.mubr.msk.f32.mxu0 %vm40_vm1, %v24_v2  ;;  %v410_v47 = vld [vmem:[%s1610_s4 + $0x20] sm:$0xff]  ;;  %v758_v54 = vld [vmem:[%s1611_s5 + $0x18] sm:$0xff]  ;;  %v757_v56 = vld [vmem:[%s1611_s5 + $0x10] sm:$0xff]  ;;  %s1086_s4 = sshll.u32 %s1381_s19, 4  ;;  %s1087_s4 = int_to_ptr.vmem [resolvable:$true] %s1086_s4 }
   0xc   :  { %1228 = vmatprep.subr.mxu0 %v38_v7  ;;  %v766_v55 = vld [vmem:[%s1611_s5 + $0x58] sm:$0xff]  ;;  %v765_v57 = vld [vmem:[%s1611_s5 + $0x50] sm:$0xff]  ;;  %v756_v58 = vld [vmem:[%s1611_s5 + $0x8] sm:$0xff]  ;;  %s1359_s20 = scalar_lea.vmem %s1087_s4, 256  ;;  %p1364_p1 = scmp.lt.s32.totalorder %s1087_s4, %s1087_s4 }
   0xd   :  { %1229 = vmatpush3.msra.mxu0 %v38_v7  ;;  %v764_v59 = vld [vmem:[%s1611_s5 + $0x48] sm:$0xff]  ;;  %v755_v60 = vld [vmem:[%s1611_s5] sm:$0xff]  ;;  %v762_v62 = vld [vmem:[%s1611_s5 + $0x38] sm:$0xff]  ;;  %p1360_p0 = scmp.ne.s32.totalorder %s1087_s4, %s1359_s20  ;;  %p1365_p2 = scmp.lt.s32.totalorder %s1359_s20, %s1359_s20 }
   0xe   :  { %1231 = vmatmul.mubr.msk.f32.vlgmr.msra.gmra.mxu0 %vm40_vm1, %v25_v3  ;;  %1254 = vmatprep.subr.mxu0 %v409_v20  ;;  %v763_v61 = vld [vmem:[%s1611_s5 + $0x40] sm:$0xff] }
   0xf   :  { %1255 = vmatpush3.msra.mxu0 %v409_v20  ;;  %p1366_p3 = por %p1365_p2, %p1364_p1 }
  0x10   :  { %1256 = vmatprep.subr.mxu0 %v408_v22 }
  0x11   :  { %1257 = vmatpush3.msra.mxu0 %v408_v22  ;;  %p1367_p4 = pnand %p1366_p3, %p1360_p0 }
  0x12   :  { %1258 = vmatprep.subr.mxu0 %v407_v24 }
  0x13   :  { %1259 = vmatpush3.msra.mxu0 %v407_v24 }
  0x14   :  { %1260 = vmatprep.subr.mxu0 %v406_v26 }
  0x15   :  { %1261 = vmatpush3.msra.mxu0 %v406_v26 }
  0x16   :  { %1265 = vmatprep.subr.mxu0 %v413_v28 }
  0xc6   :  { %v1218_v9 = vpop.f32.mrf.mxu0 }
  0xc8   :  { %v117_v10 = vpop.f32.mrf.mxu0 }
  0xca   :  { %v1225_v11 = vpop.f32.mrf.mxu0 }
  0xcc   :  { %v195_v12 = vpop.f32.mrf.mxu0 }
  0xce   :  { %v1232_v13 = vpop.f32.mrf.mxu0 }
  0xcf   :  { %1233 = vmatprep.subr.mxu1 %v1232_v13 }
  0xd0   :  { %v273_v14 = vpop.f32.mrf.mxu0  ;;  %1234 = vmatpush3.msra.mxu1 %v1232_v13 }
  0xd1   :  { %1235 = vmatprep.subr.mxu1 %v273_v14 }
  0xd2   :  { %1236 = vmatpush3.msra.mxu1 %v273_v14 }
  0xd3   :  { %1237 = vmatprep.subr.mxu1 %v1225_v11 }
  0xd4   :  { %1238 = vmatpush3.msra.mxu1 %v1225_v11 }
  0xd5   :  { %1239 = vmatprep.subr.mxu1 %v195_v12 }
  0xd6   :  { %1240 = vmatpush3.msra.mxu1 %v195_v12 }
  0xd7   :  { %1241 = vmatprep.subr.mxu1 %v1218_v9 }
  0xd8   :  { %1242 = vmatpush3.msra.mxu1 %v1218_v9 }
  0xd9   :  { %1243 = vmatprep.subr.mxu1 %v117_v10 }
  0xda   :  { %1244 = vmatpush3.msra.mxu1 %v117_v10 }
  0xdb   :  { %1246 = vmatmul.mubr.msk.f32.vlgmr.msra.gmra.mxu1 %vm282_vm2, %v1465_v15  ;;  %1276 = vmatprep.subr.mxu1 %v417_v21 }
  0xdc   :  { %1248 = vmatprep.mubr.msk.f32.mxu1 %vm282_vm2, %v1470_v16  ;;  %1277 = vmatpush3.msra.mxu1 %v417_v21 }
  0xdd   :  { %1278 = vmatprep.subr.mxu1 %v416_v23 }
  0xde   :  { %1279 = vmatpush3.msra.mxu1 %v416_v23 }
  0xdf   :  { %1249 = vmatmul.mubr.msk.f32.gmra.mxu1 %vm282_vm2, %v1479_v17  ;;  %1280 = vmatprep.subr.mxu1 %v415_v25 }
  0xe0   :  { %1251 = vmatprep.mubr.msk.f32.mxu1 %vm282_vm2, %v1484_v18  ;;  %1281 = vmatpush3.msra.mxu1 %v415_v25  ;;  %v33_v25 = vld [vmem:[%s1608_s2 + $0x8] sm:$0xff] }
  0xe1   :  { %1282 = vmatprep.subr.mxu1 %v414_v27 }
  0xe2   :  { %1283 = vmatpush3.msra.mxu1 %v414_v27 }
  0xe3   :  { %1252 = vmatmul.mubr.msk.f32.gmra.mxu1 %vm282_vm2, %v1493_v19  ;;  %1308 = vmatprep.subr.mxu1 %v758_v54 }
 0x19b   :  { %v1247_v29 = vpop.f32.mrf.mxu1 }
 0x19c   :  { %v397_v37 = vmax.f32 %v1247_v29, 0.0 }
 0x19d   :  { %v367_v30 = vpop.f32.mrf.mxu1 }
 0x19e   :  { %v396_v36 = vmax.f32 %v367_v30, 0.0 }
 0x19f   :  { %v1250_v31 = vpop.f32.mrf.mxu1 }
 0x1a0   :  { %v399_v34 = vmax.f32 %v1250_v31, 0.0 }
 0x1a1   :  { %v377_v32 = vpop.f32.mrf.mxu1 }
 0x1a2   :  { %v398_v33 = vmax.f32 %v377_v32, 0.0  ;;  %v403_v42 = vadd.f32 %v399_v34, %v397_v37 }
 0x1a3   :  { %v1253_v35 = vpop.f32.mrf.mxu1 }
 0x1a4   :  { %v401_v38 = vmax.f32 %v1253_v35, 0.0  ;;  %v402_v40 = vadd.f32 %v398_v33, %v396_v36 }
 0x1a5   :  { %v387_v39 = vpop.f32.mrf.mxu1 }
 0x1a6   :  { %v400_v41 = vmax.f32 %v387_v39, 0.0  ;;  %v405_v44 = vadd.f32 %v403_v42, %v401_v38 }
 0x1a8   :  { %v404_v43 = vadd.f32 %v402_v40, %v400_v41 }
 0x1aa   :  { %1262 = vmatprep.mubr.msk.f32.mxu0 %vm418_vm3, %v404_v43  ;;  %1284 = vmatprep.mubr.msk.f32.mxu1 %vm418_vm3, %v404_v43 }
 0x1ab   :  { %1263 = vmatmul.mubr.msk.f32.vlgmr.msra.gmra.mxu0 %vm418_vm3, %v405_v44  ;;  %1285 = vmatmul.mubr.msk.f32.vlgmr.msra.gmra.mxu1 %vm418_vm3, %v405_v44 }
 0x1ac   :  { %1266 = vmatpush3.msra.mxu0 %v413_v28  ;;  %1273 = vmatprep.mubr.msk.f32.mxu0 %vm418_vm3, %v404_v43 }
 0x1ad   :  { %1267 = vmatprep.subr.mxu0 %v412_v45  ;;  %1309 = vmatpush3.msra.mxu1 %v758_v54 }
 0x1ae   :  { %1268 = vmatpush3.msra.mxu0 %v412_v45  ;;  %1310 = vmatprep.subr.mxu1 %v757_v56 }
 0x1af   :  { %1269 = vmatprep.subr.mxu0 %v411_v46  ;;  %1311 = vmatpush3.msra.mxu1 %v757_v56 }
 0x1b0   :  { %1270 = vmatpush3.msra.mxu0 %v411_v46  ;;  %1312 = vmatprep.subr.mxu1 %v756_v58 }
 0x1b1   :  { %1271 = vmatprep.subr.mxu0 %v410_v47  ;;  %1313 = vmatpush3.msra.mxu1 %v756_v58 }
 0x1b2   :  { %1272 = vmatpush3.msra.mxu0 %v410_v47  ;;  %1314 = vmatprep.subr.mxu1 %v755_v60 }
 0x1b3   :  { %1274 = vmatmul.mubr.msk.f32.vlgmr.msra.gmra.mxu0 %vm418_vm3, %v405_v44  ;;  %1315 = vmatpush3.msra.mxu1 %v755_v60 }
 0x1b4   :  { %1299 = vmatprep.mubr.msk.f32.mxu0 %vm282_vm2, %v1458_v8  ;;  %1319 = vmatprep.subr.mxu1 %v762_v62 }
 0x26b   :  { %v1286_v48 = vpop.f32.mrf.mxu1  ;;  %v1264_v49 = vpop.f32.mrf.mxu0 }
 0x26c   :  { %1287 = vmatprep.subr.mxu0 %v1286_v48 }
 0x26d   :  { %v641_v50 = vpop.f32.mrf.mxu1  ;;  %1288 = vmatpush3.msra.mxu0 %v1286_v48  ;;  %v491_v51 = vpop.f32.mrf.mxu0 }
 0x26e   :  { %1289 = vmatprep.subr.mxu0 %v641_v50 }
 0x26f   :  { %1290 = vmatpush3.msra.mxu0 %v641_v50 }
 0x273   :  { %v1275_v52 = vpop.f32.mrf.mxu0 }
 0x274   :  { %1291 = vmatprep.subr.mxu0 %v1275_v52 }
 0x275   :  { %v566_v53 = vpop.f32.mrf.mxu0  ;;  %1292 = vmatpush3.msra.mxu0 %v1275_v52 }
 0x276   :  { %1293 = vmatprep.subr.mxu0 %v566_v53 }
 0x277   :  { %1294 = vmatpush3.msra.mxu0 %v566_v53 }
 0x278   :  { %1295 = vmatprep.subr.mxu0 %v1264_v49 }
 0x279   :  { %1296 = vmatpush3.msra.mxu0 %v1264_v49 }
 0x27a   :  { %1297 = vmatprep.subr.mxu0 %v491_v51 }
 0x27b   :  { %1298 = vmatpush3.msra.mxu0 %v491_v51 }
 0x27c   :  { %1300 = vmatmul.mubr.msk.f32.vlgmr.msra.gmra.mxu0 %vm282_vm2, %v1465_v15  ;;  %1330 = vmatprep.subr.mxu0 %v766_v55  ;;  %v761_v15 = vld [vmem:[%s1611_s5 + $0x30] sm:$0xff] }
 0x27d   :  { %1302 = vmatprep.mubr.msk.f32.mxu0 %vm282_vm2, %v1470_v16  ;;  %1331 = vmatpush3.msra.mxu0 %v766_v55  ;;  %v760_v16 = vld [vmem:[%s1611_s5 + $0x28] sm:$0xff] }
 0x27e   :  { %1332 = vmatprep.subr.mxu0 %v765_v57 }
 0x27f   :  { %1333 = vmatpush3.msra.mxu0 %v765_v57 }
 0x280   :  { %1303 = vmatmul.mubr.msk.f32.gmra.mxu0 %vm282_vm2, %v1479_v17  ;;  %1334 = vmatprep.subr.mxu0 %v764_v59  ;;  %v759_v17 = vld [vmem:[%s1611_s5 + $0x20] sm:$0xff] }
 0x281   :  { %1305 = vmatprep.mubr.msk.f32.mxu0 %vm282_vm2, %v1484_v18  ;;  %1335 = vmatpush3.msra.mxu0 %v764_v59  ;;  %v32_v18 = vld [vmem:[%s1608_s2] sm:$0xff] }
 0x282   :  { %1336 = vmatprep.subr.mxu0 %v763_v61 }
 0x283   :  { %1337 = vmatpush3.msra.mxu0 %v763_v61 }
 0x284   :  { %1306 = vmatmul.mubr.msk.f32.gmra.mxu0 %vm282_vm2, %v1493_v19 }
 0x33c   :  { %v1301_v63 = vpop.f32.mrf.mxu0 }
 0x33d   :  { %v746_v7 = vmax.f32 %v1301_v63, 0.0 }
 0x33e   :  { %v716_v0 = vpop.f32.mrf.mxu0 }
 0x33f   :  { %v745_v6 = vmax.f32 %v716_v0, 0.0 }
 0x340   :  { %v1304_v1 = vpop.f32.mrf.mxu0 }
 0x341   :  { %v748_v4 = vmax.f32 %v1304_v1, 0.0 }
 0x342   :  { %v726_v2 = vpop.f32.mrf.mxu0 }
 0x343   :  { %v747_v3 = vmax.f32 %v726_v2, 0.0  ;;  %v752_v12 = vadd.f32 %v748_v4, %v746_v7 }
 0x344   :  { %v1307_v5 = vpop.f32.mrf.mxu0 }
 0x345   :  { %v750_v8 = vmax.f32 %v1307_v5, 0.0  ;;  %v751_v10 = vadd.f32 %v747_v3, %v745_v6 }
 0x346   :  { %v736_v9 = vpop.f32.mrf.mxu0 }
 0x347   :  { %v749_v11 = vmax.f32 %v736_v9, 0.0  ;;  %v754_v14 = vadd.f32 %v752_v12, %v750_v8 }
 0x349   :  { %v753_v13 = vadd.f32 %v751_v10, %v749_v11 }
 0x34b   :  { %1316 = vmatprep.mubr.msk.f32.mxu1 %vm418_vm3, %v753_v13  ;;  %1338 = vmatprep.mubr.msk.f32.mxu0 %vm418_vm3, %v753_v13 }
 0x34c   :  { %1317 = vmatmul.mubr.msk.f32.vlgmr.msra.gmra.mxu1 %vm418_vm3, %v754_v14  ;;  %1339 = vmatmul.mubr.msk.f32.vlgmr.msra.gmra.mxu0 %vm418_vm3, %v754_v14 }
 0x34d   :  { %1320 = vmatpush3.msra.mxu1 %v762_v62  ;;  %1327 = vmatprep.mubr.msk.f32.mxu1 %vm418_vm3, %v753_v13 }
 0x34e   :  { %1321 = vmatprep.subr.mxu1 %v761_v15 }
 0x34f   :  { %1322 = vmatpush3.msra.mxu1 %v761_v15 }
 0x350   :  { %1323 = vmatprep.subr.mxu1 %v760_v16 }
 0x351   :  { %1324 = vmatpush3.msra.mxu1 %v760_v16 }
 0x352   :  { %1325 = vmatprep.subr.mxu1 %v759_v17 }
 0x353   :  { %1326 = vmatpush3.msra.mxu1 %v759_v17 }
 0x354   :  { %1328 = vmatmul.mubr.msk.f32.vlgmr.msra.gmra.mxu1 %vm418_vm3, %v754_v14 }
 0x355   :  { %1353 = vmatprep.mubr.msk.f32.mxu1 %vm282_vm2, %v32_v18 }
 0x40c   :  { %v1340_v19 = vpop.f32.mrf.mxu0  ;;  %v1318_v20 = vpop.f32.mrf.mxu1 }
 0x40d   :  { %1341 = vmatprep.subr.mxu1 %v1340_v19 }
 0x40e   :  { %v989_v21 = vpop.f32.mrf.mxu0  ;;  %1342 = vmatpush3.msra.mxu1 %v1340_v19  ;;  %v839_v22 = vpop.f32.mrf.mxu1 }
 0x40f   :  { %1343 = vmatprep.subr.mxu1 %v989_v21 }
 0x410   :  { %1344 = vmatpush3.msra.mxu1 %v989_v21 }
 0x414   :  { %v1329_v23 = vpop.f32.mrf.mxu1 }
 0x415   :  { %1345 = vmatprep.subr.mxu1 %v1329_v23 }
 0x416   :  { %v914_v24 = vpop.f32.mrf.mxu1  ;;  %1346 = vmatpush3.msra.mxu1 %v1329_v23 }
 0x417   :  { %1347 = vmatprep.subr.mxu1 %v914_v24 }
 0x418   :  { %1348 = vmatpush3.msra.mxu1 %v914_v24 }
 0x419   :  { %1349 = vmatprep.subr.mxu1 %v1318_v20 }
 0x41a   :  { %1350 = vmatpush3.msra.mxu1 %v1318_v20 }
 0x41b   :  { %1351 = vmatprep.subr.mxu1 %v839_v22 }
 0x41c   :  { %1352 = vmatpush3.msra.mxu1 %v839_v22 }
 0x41d   :  { %1354 = vmatmul.mubr.msk.f32.vlgmr.msra.gmra.mxu1 %vm282_vm2, %v33_v25 }
 0x4dd   :  { %v1355_v26 = vpop.f32.mrf.mxu1 }
 0x4de   :  { %1080 = vst.msk [vmem:[#allocation2 + $0x8] sm:$0xff] %vm418_vm3, %v1355_v26 }
 0x4df   :  { %v1070_v27 = vpop.f32.mrf.mxu1 }
 0x4e0   :  { %1079 = vst.msk [vmem:[#allocation2] sm:$0xff] %vm418_vm3, %v1070_v27 }
 0x4e1   :  { %1370 = shalt.err (!%p1367_p4)
}
 0x4e2   :  { %s1382_s2 = smov 128   ;;  %s1383_s21 = smov 8  }
 0x4e3   :  { %1092 = dma.vmem_to_hbm [thread:$0]  %s1087_s4, 256, %s1612_s6, [#allocation3], %s1382_s2, %s1382_s2, %s1383_s21  }
 0x4e4   :  { %1379 = dma.done.wait [#allocation3], 256  }
 0x4e5   :  { %1380 = vsyncadd [#allocation3], 4294967040 }
 0x4e6   :  { %1096 = vsyncpa [#allocation3], 1 }

</bundles_post_ra>
